<compile_context>
chip_gen: v7x
topology: tpu7x:2x2x1
jax: 0.10.0
libtpu: 0.0.40
codegen_flags: <defaults>
</compile_context>

<pallas_src>
import functools

import jax
import jax.numpy as jnp
from jax.experimental import pallas as pl
from jax.experimental.pallas import tpu as pltpu


def _round_up(v, m):
    return ((v + m - 1) // m) * m


def _gcn_kernel(x_ref, w1t_ref, b1_ref, w2_ref, o_ref, *, batch, s_pad):
    # x_ref:   (B*Sp, Np)  lane-dense (Np is a multiple of 128)
    # w1t_ref: (Np, Np)    conv1 weight, already transposed + zero-padded
    # b1_ref:  (1, Np)     conv1 bias (zero in the padded lanes)
    # w2_ref:  (Sp, Sp)    conv2 weight (zero in padded rows/cols)
    # o_ref:   (B*Sp, Np)
    x = x_ref[...]

    # conv1 over the node axis: one big (B*Sp, Np) @ (Np, Np) MXU matmul.
    h = jnp.dot(x, w1t_ref[...], preferred_element_type=jnp.float32)
    h = h + b1_ref[...]
    # residual add, then ReLU (module does conv2(relu(h + x))).
    h = jnp.maximum(h + x, 0.0)

    w2 = w2_ref[...]
    # conv2 mixes the state axis per batch; batch is tiny and static -> unroll.
    for b in range(batch):
        hb = h[b * s_pad:(b + 1) * s_pad, :]
        o_ref[b * s_pad:(b + 1) * s_pad, :] = jnp.dot(
            w2, hb, preferred_element_type=jnp.float32
        ).astype(o_ref.dtype)


def gcn_forward(x, w1, b1, w2):
    """x: (B, S, N) float32; w1: (N, N); b1: (N,); w2: (S, S) -> (B, S, N)."""
    B, S, N = x.shape
    Np = _round_up(N, 128)   # lane-dense last dim
    Sp = _round_up(S, 8)     # sublane-aligned rows per batch

    # Wrapper-side (XLA) layout plumbing: pad, fold batch into rows,
    # pre-transpose w1 so the kernel never transposes anything.
    x_p = jnp.pad(x, ((0, 0), (0, Sp - S), (0, Np - N)))
    x2d = x_p.reshape(B * Sp, Np)
    w1t = jnp.pad(w1, ((0, Np - N), (0, Np - N))).T           # (Np, Np)
    b1p = jnp.pad(b1, (0, Np - N)).reshape(1, Np)             # (1, Np)
    w2p = jnp.pad(w2, ((0, Sp - S), (0, Sp - S)))             # (Sp, Sp)

    flops = 2 * (B * Sp) * Np * Np + 2 * B * Sp * Sp * Np
    bytes_accessed = 4 * (2 * B * Sp * Np + Np * Np + Np + Sp * Sp)

    kernel = functools.partial(_gcn_kernel, batch=B, s_pad=Sp)

    out2d = pl.pallas_call(
        kernel,
        out_shape=jax.ShapeDtypeStruct((B * Sp, Np), x.dtype),
        grid_spec=pltpu.PrefetchScalarGridSpec(
            num_scalar_prefetch=0,
            grid=(1,),                                   # single invocation
            in_specs=[
                pl.BlockSpec((B * Sp, Np), lambda i: (0, 0)),   # x (folded)
                pl.BlockSpec((Np, Np), lambda i: (0, 0)),       # conv1 weight^T
                pl.BlockSpec((1, Np), lambda i: (0, 0)),        # conv1 bias
                pl.BlockSpec((Sp, Sp), lambda i: (0, 0)),       # conv2 weight
            ],
            out_specs=pl.BlockSpec((B * Sp, Np), lambda i: (0, 0)),
        ),
        compiler_params=pltpu.CompilerParams(
            dimension_semantics=("arbitrary",),
        ),
        cost_estimate=pl.CostEstimate(
            flops=flops, transcendentals=0, bytes_accessed=bytes_accessed
        ),
    )(x2d, w1t, b1p, w2p)

    # Undo the layout plumbing (pure XLA, cheap at these sizes).
    return out2d.reshape(B, Sp, Np)[:, :S, :N]


def gcn_reference(x, w1, b1, w2):
    """Pure-JAX reference mirroring the PyTorch forward exactly."""
    h = jnp.einsum("bsn,in->bsi", x, w1) + b1[None, None, :]
    h = h + x
    h = jnp.maximum(h, 0.0)
    out = jnp.einsum("ts,bsn->btn", w2, h)
    return out


if __name__ == "__main__":
    B = 2           # batch
    num_state = 32  # S (channels of conv2)
    num_node = 16   # N (channels of conv1)

    key = jax.random.PRNGKey(0)
    kx, kw1, kb1, kw2 = jax.random.split(key, 4)

    x = jax.random.normal(kx, (B, num_state, num_node), dtype=jnp.float32)
    # Deterministic synthetic parameters (Conv1d kernel_size=1 weights squeezed)
    w1 = jax.random.normal(kw1, (num_node, num_node), dtype=jnp.float32) * 0.1
    b1 = jax.random.normal(kb1, (num_node,), dtype=jnp.float32) * 0.1
    w2 = jax.random.normal(kw2, (num_state, num_state), dtype=jnp.float32) * 0.1

    out = gcn_forward(x, w1, b1, w2)
    out = jax.block_until_ready(out)

    ref = gcn_reference(x, w1, b1, w2)
    assert out.shape == (B, num_state, num_node)
    assert jnp.allclose(out, ref, atol=1e-4, rtol=1e-4), "mismatch vs reference"

    print("KERNEL_OK")
</pallas_src>

<mosaic_0001>
module attributes {stable_mosaic.version = 11 : i64} {
  func.func @_gcn_kernel(%arg0: i32, %arg1: memref<64x128xf32, #tpu.memory_space<vmem>>, %arg2: memref<128x128xf32, #tpu.memory_space<vmem>>, %arg3: memref<1x128xf32, #tpu.memory_space<vmem>>, %arg4: memref<32x32xf32, #tpu.memory_space<vmem>>, %arg5: memref<64x128xf32, #tpu.memory_space<vmem>>) attributes {dimension_semantics = [#tpu.dimension_semantics<arbitrary>], iteration_bounds = array<i64: 1>, scalar_prefetch = 0 : i64, scratch_operands = 0 : i64, tpu.core_type = #tpu.core_type<tc>, window_params = [{pipeline_mode = #tpu.pipeline_mode<synchronous>, transform_indices = @transform_0, window_bounds = array<i64: 64, 128>}, {pipeline_mode = #tpu.pipeline_mode<synchronous>, transform_indices = @transform_1, window_bounds = array<i64: 128, 128>}, {pipeline_mode = #tpu.pipeline_mode<synchronous>, transform_indices = @transform_2, window_bounds = array<i64: 1, 128>}, {pipeline_mode = #tpu.pipeline_mode<synchronous>, transform_indices = @transform_3, window_bounds = array<i64: 32, 32>}, {pipeline_mode = #tpu.pipeline_mode<synchronous>, transform_indices = @transform_4, window_bounds = array<i64: 64, 128>}]} {
    %c0 = arith.constant 0 : index
    %c0_0 = arith.constant 0 : index
    %0 = vector.load %arg1[%c0, %c0_0] : memref<64x128xf32, #tpu.memory_space<vmem>>, vector<64x128xf32>
    %c0_1 = arith.constant 0 : index
    %c0_2 = arith.constant 0 : index
    %1 = vector.load %arg2[%c0_1, %c0_2] : memref<128x128xf32, #tpu.memory_space<vmem>>, vector<128x128xf32>
    %cst = arith.constant dense<0.000000e+00> : vector<64x128xf32>
    %2 = tpu.matmul %0, %1, %cst {dimension_numbers = #tpu.dot_dimension_numbers<[1], [0], [0], [1], [0, 0, 1, 1], [], []>} : vector<64x128xf32>, vector<128x128xf32>, vector<64x128xf32> -> vector<64x128xf32>
    %c0_3 = arith.constant 0 : index
    %c0_4 = arith.constant 0 : index
    %3 = vector.load %arg3[%c0_3, %c0_4] : memref<1x128xf32, #tpu.memory_space<vmem>>, vector<1x128xf32>
    %4 = vector.broadcast %3 : vector<1x128xf32> to vector<64x128xf32>
    %5 = arith.addf %2, %4 : vector<64x128xf32>
    %6 = arith.addf %5, %0 : vector<64x128xf32>
    %cst_5 = arith.constant 0.000000e+00 : f32
    %7 = vector.broadcast %cst_5 : f32 to vector<64x128xf32>
    %8 = arith.maximumf %6, %7 : vector<64x128xf32>
    %c0_6 = arith.constant 0 : index
    %c0_7 = arith.constant 0 : index
    %9 = vector.load %arg4[%c0_6, %c0_7] : memref<32x32xf32, #tpu.memory_space<vmem>>, vector<32x32xf32>
    %10 = vector.extract_strided_slice %8 {offsets = [0, 0], sizes = [32, 128], strides = [1, 1]} : vector<64x128xf32> to vector<32x128xf32>
    %cst_8 = arith.constant dense<0.000000e+00> : vector<32x128xf32>
    %11 = tpu.matmul %9, %10, %cst_8 {dimension_numbers = #tpu.dot_dimension_numbers<[1], [0], [0], [1], [0, 0, 1, 1], [], []>} : vector<32x32xf32>, vector<32x128xf32>, vector<32x128xf32> -> vector<32x128xf32>
    %c0_9 = arith.constant 0 : index
    %c0_10 = arith.constant 0 : index
    %12 = vector.load %arg5[%c0_9, %c0_10] : memref<64x128xf32, #tpu.memory_space<vmem>>, vector<32x128xf32>
    tpu.vector_store %arg5[%c0_9, %c0_10], %11 {strides = array<i32>} : memref<64x128xf32, #tpu.memory_space<vmem>>, vector<32x128xf32>,
    %13 = vector.extract_strided_slice %8 {offsets = [32, 0], sizes = [32, 128], strides = [1, 1]} : vector<64x128xf32> to vector<32x128xf32>
    %cst_11 = arith.constant dense<0.000000e+00> : vector<32x128xf32>
    %14 = tpu.matmul %9, %13, %cst_11 {dimension_numbers = #tpu.dot_dimension_numbers<[1], [0], [0], [1], [0, 0, 1, 1], [], []>} : vector<32x32xf32>, vector<32x128xf32>, vector<32x128xf32> -> vector<32x128xf32>
    %c32 = arith.constant 32 : index
    %c0_12 = arith.constant 0 : index
    %15 = vector.load %arg5[%c32, %c0_12] : memref<64x128xf32, #tpu.memory_space<vmem>>, vector<32x128xf32>
    tpu.vector_store %arg5[%c32, %c0_12], %14 {strides = array<i32>} : memref<64x128xf32, #tpu.memory_space<vmem>>, vector<32x128xf32>,
    return
  }
  func.func @transform_0(%arg0: i32) -> (i32, i32) {
    %c0_i32 = arith.constant 0 : i32
    %c0_i32_0 = arith.constant 0 : i32
    %c0_i32_1 = arith.constant 0 : i32
    return %c0_i32, %c0_i32_0 : i32, i32
  }
  func.func @transform_1(%arg0: i32) -> (i32, i32) {
    %c0_i32 = arith.constant 0 : i32
    %c0_i32_0 = arith.constant 0 : i32
    %c0_i32_1 = arith.constant 0 : i32
    return %c0_i32, %c0_i32_0 : i32, i32
  }
  func.func @transform_2(%arg0: i32) -> (i32, i32) {
    %c0_i32 = arith.constant 0 : i32
    %c0_i32_0 = arith.constant 0 : i32
    %c0_i32_1 = arith.constant 0 : i32
    return %c0_i32, %c0_i32_0 : i32, i32
  }
  func.func @transform_3(%arg0: i32) -> (i32, i32) {
    %c0_i32 = arith.constant 0 : i32
    %c0_i32_0 = arith.constant 0 : i32
    %c0_i32_1 = arith.constant 0 : i32
    return %c0_i32, %c0_i32_0 : i32, i32
  }
  func.func @transform_4(%arg0: i32) -> (i32, i32) {
    %c0_i32 = arith.constant 0 : i32
    %c0_i32_0 = arith.constant 0 : i32
    %c0_i32_1 = arith.constant 0 : i32
    return %c0_i32, %c0_i32_0 : i32, i32
  }
}

</mosaic_0001>

<bundles_post_ra>
// kernel: tpu_custom_call.1
= control target key start
LH: loop header
LB: loop body
LE: loop exit
PB: predicated region body
PF: predicated region fallthrough
CT: control target
= control target key end

     0   :  { %9 = vsyncpa [#allocation3], 0  ;;  %s802_s0 = inlined_call_operand.hbm [shape: f32[64,128], index: 0, kind: input, shape index: {}]   ;;  %s803_s1 = inlined_call_operand.hbm [shape: f32[128,128], index: 1, kind: input, shape index: {}]   ;;  %s804_s2 = inlined_call_operand.vmem [shape: f32[1,128], index: 2, kind: input, shape index: {}]   ;;  %s805_s3 = inlined_call_operand.hbm [shape: f32[32,32], index: 3, kind: input, shape index: {}]   ;;  %s806_s4 = inlined_call_operand.hbm [shape: f32[64,128], index: 4, kind: output, shape index: {}]  }
   0x1   :  { %10 = vsyncpa [#allocation6], 0 }
   0x2   :  { %11 = vsyncpa [#allocation4], 0  ;;  %s693_s15 = smov [#allocation5]   ;;  %s694_s17 = smov [#allocation2]  }
   0x3   :  { %s29_s16 = sshll.u32 %s693_s15, 4  ;;  %s17_s18 = sshll.u32 %s694_s17, 4  ;;  %s30_s16 = int_to_ptr.vmem [resolvable:$true] %s29_s16  ;;  %s724_s18 = int_to_ptr.vmem [resolvable:$true] %s17_s18 }
   0x4   :  { %s599_s21 = scalar_lea.hbm %s803_s1, 2048 }
   0x5   :  { %p600_p0 = scmp.ne.s32.totalorder %s803_s1, %s599_s21  ;;  %p603_p1 = scmp.lt.u32.totalorder %s599_s21, %s803_s1 }
   0x7   :  { %p605_p2 = pnand %p603_p1, %p600_p0 }
   0x9   :  { %608 = shalt.err (!%p605_p2)
}
   0xa   :  { %s609_s26 = scalar_lea.vmem %s30_s16, 2048  ;;  %p614_p4 = scmp.lt.s32.totalorder %s30_s16, %s30_s16 }
   0xb   :  { %p610_p3 = scmp.ne.s32.totalorder %s30_s16, %s609_s26  ;;  %p615_p5 = scmp.lt.s32.totalorder %s609_s26, %s609_s26 }
   0xd   :  { %p616_p6 = por %p615_p5, %p614_p4 }
   0xf   :  { %p617_p7 = pnand %p616_p6, %p610_p3 }
  0x11   :  { %620 = shalt.err (!%p617_p7)
}
  0x12   :  { %s695_s27 = smov 128   ;;  %s696_s28 = smov 8  }
  0x13   :  { %35 = dma.hbm_to_vmem [thread:$0]  %s803_s1, 2048, %s30_s16, [#allocation6], %s695_s27, %s695_s27, %s696_s28  }
  0x14   :  { %s621_s7 = scalar_lea.hbm %s802_s0, 1024 }
  0x15   :  { %p622_p8 = scmp.ne.s32.totalorder %s802_s0, %s621_s7  ;;  %p625_p9 = scmp.lt.u32.totalorder %s621_s7, %s802_s0 }
  0x17   :  { %p627_p10 = pnand %p625_p9, %p622_p8 }
  0x19   :  { %630 = shalt.err (!%p627_p10)
}
  0x1a   :  { %s631_s12 = scalar_lea.vmem %s724_s18, 1024  ;;  %p636_p12 = scmp.lt.s32.totalorder %s724_s18, %s724_s18 }
  0x1b   :  { %p632_p11 = scmp.ne.s32.totalorder %s724_s18, %s631_s12  ;;  %p637_p13 = scmp.lt.s32.totalorder %s631_s12, %s631_s12 }
  0x1d   :  { %p638_p0 = por %p637_p13, %p636_p12 }
  0x1f   :  { %p639_p1 = pnand %p638_p0, %p632_p11 }
  0x21   :  { %642 = shalt.err (!%p639_p1)
}
  0x22   :  { %23 = dma.hbm_to_vmem [thread:$0]  %s802_s0, 1024, %s724_s18, [#allocation3], %s695_s27, %s695_s27, %s696_s28  }
  0x23   :  { %s697_s14 = smov [#allocation7]   ;;  %s643_s19 = scalar_lea.hbm %s805_s3, 512 }
  0x24   :  { %s43_s15 = sshll.u32 %s697_s14, 4  ;;  %p644_p2 = scmp.ne.s32.totalorder %s805_s3, %s643_s19  ;;  %s44_s15 = int_to_ptr.vmem [resolvable:$true] %s43_s15 }
  0x25   :  { %p647_p3 = scmp.lt.u32.totalorder %s643_s19, %s805_s3 }
  0x27   :  { %p649_p4 = pnand %p647_p3, %p644_p2 }
  0x29   :  { %652 = shalt.err (!%p649_p4)
}
  0x2a   :  { %s653_s24 = scalar_lea.vmem %s44_s15, 512  ;;  %p658_p6 = scmp.lt.s32.totalorder %s44_s15, %s44_s15 }
  0x2b   :  { %p654_p5 = scmp.ne.s32.totalorder %s44_s15, %s653_s24  ;;  %p659_p7 = scmp.lt.s32.totalorder %s653_s24, %s653_s24 }
  0x2d   :  { %p660_p8 = por %p659_p7, %p658_p6 }
  0x2f   :  { %p661_p9 = pnand %p660_p8, %p654_p5 }
  0x31   :  { %664 = shalt.err (!%p661_p9)
}
  0x32   :  { %49 = dma.hbm_to_vmem [thread:$0]  %s805_s3, 512, %s44_s15, [#allocation6], %s695_s27, %s695_s27, %s696_s28  }
  0x33   :  { %687 = dma.done.wait [#allocation3], 1024  }
  0x34   :  { %688 = vsyncadd [#allocation3], 4294966272 }
  0x35   :  { %689 = dma.done.wait [#allocation6], 2560  }
  0x36   :  { %690 = vsyncadd [#allocation6], 4294964736  ;;  %v67_v0 = vld [vmem:[#allocation5] sm:$0xff]  ;;  %v68_v1 = vld [vmem:[#allocation5 + $0x8] sm:$0xff]  ;;  %vm215_vm0 = vcmask 261120  }
  0x37   :  { %v69_v2 = vld [vmem:[#allocation5 + $0x10] sm:$0xff]  ;;  %v545_v3 = vpack.c.bf16 %v68_v1, %v67_v0  ;;  %v70_v4 = vld [vmem:[#allocation5 + $0x18] sm:$0xff]  ;;  %v71_v6 = vld [vmem:[#allocation5 + $0x20] sm:$0xff] }
  0x38   :  { %v549_v5 = vpack.c.bf16 %v70_v4, %v69_v2  ;;  %v72_v7 = vld [vmem:[#allocation5 + $0x28] sm:$0xff]  ;;  %v59_v9 = vld [vmem:[#allocation2] sm:$0xff]  ;;  %v73_v10 = vld [vmem:[#allocation5 + $0x30] sm:$0xff] }
  0x39   :  { %546 = vmatprep.subr.bf16.mxu0 %v545_v3  ;;  %v553_v8 = vpack.c.bf16 %v72_v7, %v71_v6  ;;  %v74_v11 = vld [vmem:[#allocation5 + $0x38] sm:$0xff]  ;;  %505 = vmatprep.mubr.f32.mxu0 %v59_v9  ;;  %v75_v13 = vld [vmem:[#allocation5 + $0x40] sm:$0xff]  ;;  %v76_v14 = vld [vmem:[#allocation5 + $0x48] sm:$0xff] }
  0x3a   :  { %548 = vmatpush3.bf16.msra.mxu0 %v545_v3  ;;  %v557_v12 = vpack.c.bf16 %v74_v11, %v73_v10  ;;  %v561_v15 = vpack.c.bf16 %v76_v14, %v75_v13  ;;  %v77_v16 = vld [vmem:[#allocation5 + $0x50] sm:$0xff]  ;;  %v78_v17 = vld [vmem:[#allocation5 + $0x58] sm:$0xff]  ;;  %v79_v19 = vld [vmem:[#allocation5 + $0x60] sm:$0xff] }
  0x3b   :  { %550 = vmatprep.subr.bf16.mxu0 %v549_v5  ;;  %v565_v18 = vpack.c.bf16 %v78_v17, %v77_v16  ;;  %v80_v20 = vld [vmem:[#allocation5 + $0x68] sm:$0xff]  ;;  %v81_v22 = vld [vmem:[#allocation5 + $0x70] sm:$0xff]  ;;  %v82_v23 = vld [vmem:[#allocation5 + $0x78] sm:$0xff] }
  0x3c   :  { %v569_v21 = vpack.c.bf16 %v80_v20, %v79_v19  ;;  %v573_v24 = vpack.c.bf16 %v82_v23, %v81_v22  ;;  %v60_v25 = vld [vmem:[#allocation2 + $0x8] sm:$0xff]  ;;  %v61_v26 = vld [vmem:[#allocation2 + $0x10] sm:$0xff]  ;;  %v62_v27 = vld [vmem:[#allocation2 + $0x18] sm:$0xff] }
  0x3d   :  { %v63_v28 = vld [vmem:[#allocation2 + $0x20] sm:$0xff]  ;;  %v64_v29 = vld [vmem:[#allocation2 + $0x28] sm:$0xff]  ;;  %v65_v30 = vld [vmem:[#allocation2 + $0x30] sm:$0xff] }
  0x3e   :  { %552 = vmatpush3.bf16.msra.mxu0 %v549_v5  ;;  %v66_v31 = vld [vmem:[#allocation2 + $0x38] sm:$0xff]  ;;  %v211_v32 = vld [vmem:[#allocation7] sm:$0xff]  ;;  %v212_v1 = vld [vmem:[#allocation7 + $0x8] sm:$0xff] }
  0x3f   :  { %554 = vmatprep.subr.bf16.mxu0 %v553_v8  ;;  %525 = vmatprep.mubr.msk.f32.mxu1 %vm215_vm0, %v211_v32  ;;  %v424_v33 = vld [vmem:[%s804_s2] ss:$0 sm:$0xff]  ;;  %v213_v4 = vld [vmem:[#allocation7 + $0x10] sm:$0xff]  ;;  %v214_v7 = vld [vmem:[#allocation7 + $0x18] sm:$0xff]  ;;  %s698_s2 = smov [#allocation8]  }
  0x40   :  { %s411_s26 = sshll.u32 %s698_s2, 4  ;;  %s412_s26 = int_to_ptr.vmem [resolvable:$true] %s411_s26 }
  0x41   :  { %s665_s29 = scalar_lea.vmem %s412_s26, 1024  ;;  %p670_p11 = scmp.lt.s32.totalorder %s412_s26, %s412_s26 }
  0x42   :  { %556 = vmatpush3.bf16.msra.mxu0 %v553_v8  ;;  %p666_p10 = scmp.ne.s32.totalorder %s412_s26, %s665_s29  ;;  %p671_p12 = scmp.lt.s32.totalorder %s665_s29, %s665_s29 }
  0x43   :  { %558 = vmatprep.subr.bf16.mxu0 %v557_v12 }
  0x44   :  { %p672_p13 = por %p671_p12, %p670_p11 }
  0x46   :  { %560 = vmatpush3.bf16.msra.mxu0 %v557_v12  ;;  %p673_p0 = pnand %p672_p13, %p666_p10 }
  0x47   :  { %562 = vmatprep.subr.bf16.mxu0 %v561_v15 }
  0x4a   :  { %564 = vmatpush3.bf16.msra.mxu0 %v561_v15 }
  0x4b   :  { %566 = vmatprep.subr.bf16.mxu0 %v565_v18 }
  0x4e   :  { %568 = vmatpush3.bf16.msra.mxu0 %v565_v18 }
  0x4f   :  { %570 = vmatprep.subr.bf16.mxu0 %v569_v21 }
  0x52   :  { %572 = vmatpush3.bf16.msra.mxu0 %v569_v21 }
  0x53   :  { %574 = vmatprep.subr.bf16.mxu0 %v573_v24 }
  0x56   :  { %576 = vmatpush3.bf16.msra.mxu0 %v573_v24 }
  0x59   :  { %506 = vmatmul.mubr.f32.vlgmr.msra.gmra.mrb[0].mxu0 %v60_v25 }
  0x5a   :  { %508 = vmatprep.mubr.f32.mxu0 %v61_v26 }
  0x5d   :  { %509 = vmatmul.mubr.f32.gmra.mrb[2].mxu0 %v62_v27 }
  0x5e   :  { %511 = vmatprep.mubr.f32.mxu0 %v63_v28 }
  0x61   :  { %512 = vmatmul.mubr.f32.gmra.mrb[4].mxu0 %v64_v29 }
  0x62   :  { %514 = vmatprep.mubr.f32.mxu0 %v65_v30 }
  0x65   :  { %515 = vmatmul.mubr.f32.gmra.mrb[6].mxu0 %v66_v31 }
 0x12c   :  { %v507_v34 = vpop.f32.mrb[0].mxu0 }
 0x12d   :  { %v162_v35 = vadd.f32 %v507_v34, %v424_v33  ;;  %v156_v36 = vpop.f32.mrb[1].mxu0 }
 0x12e   :  { %v157_v37 = vadd.f32 %v424_v33, %v156_v36 }
 0x12f   :  { %v196_v38 = vadd.f32 %v162_v35, %v60_v25 }
 0x130   :  { %v195_v39 = vadd.f32 %v157_v37, %v59_v9  ;;  %v510_v40 = vpop.f32.mrb[2].mxu0 }
 0x131   :  { %v204_v41 = vmax.f32 %v196_v38, 0.0  ;;  %v172_v42 = vadd.f32 %v510_v40, %v424_v33  ;;  %v166_v43 = vpop.f32.mrb[3].mxu0 }
 0x132   :  { %v203_v44 = vmax.f32 %v195_v39, 0.0  ;;  %v167_v45 = vadd.f32 %v424_v33, %v166_v43 }
 0x133   :  { %v198_v46 = vadd.f32 %v172_v42, %v62_v27 }
 0x134   :  { %v197_v47 = vadd.f32 %v167_v45, %v61_v26  ;;  %v513_v48 = vpop.f32.mrb[4].mxu0  ;;  %v577_v49 = vpack.c.bf16 %v204_v41, %v203_v44 }
 0x135   :  { %v206_v50 = vmax.f32 %v198_v46, 0.0  ;;  %v182_v51 = vadd.f32 %v513_v48, %v424_v33  ;;  %v176_v52 = vpop.f32.mrb[5].mxu0 }
 0x136   :  { %v205_v53 = vmax.f32 %v197_v47, 0.0  ;;  %v177_v54 = vadd.f32 %v424_v33, %v176_v52  ;;  %578 = vmatprep.subr.bf16.mxu1 %v577_v49 }
 0x137   :  { %v200_v55 = vadd.f32 %v182_v51, %v64_v29  ;;  %580 = vmatpush3.bf16.msra.mxu1 %v577_v49 }
 0x138   :  { %v199_v56 = vadd.f32 %v177_v54, %v63_v28  ;;  %v516_v57 = vpop.f32.mrb[6].mxu0  ;;  %v581_v58 = vpack.c.bf16 %v206_v50, %v205_v53 }
 0x139   :  { %v208_v59 = vmax.f32 %v200_v55, 0.0  ;;  %v192_v60 = vadd.f32 %v516_v57, %v424_v33  ;;  %v186_v61 = vpop.f32.mrb[7].mxu0 }
 0x13a   :  { %v207_v62 = vmax.f32 %v199_v56, 0.0  ;;  %v187_v63 = vadd.f32 %v424_v33, %v186_v61  ;;  %582 = vmatprep.subr.bf16.mxu1 %v581_v58 }
 0x13b   :  { %v202_v0 = vadd.f32 %v192_v60, %v66_v31  ;;  %584 = vmatpush3.bf16.msra.mxu1 %v581_v58 }
 0x13c   :  { %v201_v2 = vadd.f32 %v187_v63, %v65_v30  ;;  %v585_v3 = vpack.c.bf16 %v208_v59, %v207_v62 }
 0x13d   :  { %v210_v5 = vmax.f32 %v202_v0, 0.0 }
 0x13e   :  { %v209_v6 = vmax.f32 %v201_v2, 0.0  ;;  %526 = vmatmul.mubr.msk.f32.vlgmr.msra.gmra.mrb[0].mxu1 %vm215_vm0, %v212_v1  ;;  %586 = vmatprep.subr.bf16.mxu1 %v585_v3 }
 0x13f   :  { %588 = vmatpush3.bf16.msra.mxu1 %v585_v3  ;;  %528 = vmatprep.mubr.msk.f32.mxu1 %vm215_vm0, %v213_v4 }
 0x140   :  { %v589_v8 = vpack.c.bf16 %v210_v5, %v209_v6 }
 0x142   :  { %529 = vmatmul.mubr.msk.f32.gmra.mrb[2].mxu1 %vm215_vm0, %v214_v7  ;;  %590 = vmatprep.subr.bf16.mxu1 %v589_v8 }
 0x143   :  { %592 = vmatpush3.bf16.msra.mxu1 %v589_v8  ;;  %539 = vmatprep.mubr.msk.f32.mxu1 %vm215_vm0, %v211_v32 }
 0x146   :  { %540 = vmatmul.mubr.msk.f32.vlgmr.msra.gmra.mrb[4].mxu1 %vm215_vm0, %v212_v1 }
 0x147   :  { %542 = vmatprep.mubr.msk.f32.mxu1 %vm215_vm0, %v213_v4 }
 0x14a   :  { %543 = vmatmul.mubr.msk.f32.gmra.mrb[6].mxu1 %vm215_vm0, %v214_v7 }
 0x211   :  { %v527_v9 = vpop.f32.mrb[0].mxu1 }
 0x212   :  { %314 = vst [vmem:[#allocation8 + $0x8] sm:$0xff] %v527_v9  ;;  %v294_v10 = vpop.f32.mrb[1].mxu1 }
 0x213   :  { %313 = vst [vmem:[#allocation8] sm:$0xff] %v294_v10 }
 0x215   :  { %v530_v11 = vpop.f32.mrb[2].mxu1 }
 0x216   :  { %316 = vst [vmem:[#allocation8 + $0x18] sm:$0xff] %v530_v11  ;;  %v304_v12 = vpop.f32.mrb[3].mxu1 }
 0x217   :  { %315 = vst [vmem:[#allocation8 + $0x10] sm:$0xff] %v304_v12 }
 0x219   :  { %v541_v13 = vpop.f32.mrb[4].mxu1 }
 0x21a   :  { %403 = vst [vmem:[#allocation8 + $0x28] sm:$0xff] %v541_v13  ;;  %v383_v14 = vpop.f32.mrb[5].mxu1 }
 0x21b   :  { %402 = vst [vmem:[#allocation8 + $0x20] sm:$0xff] %v383_v14 }
 0x21d   :  { %v544_v15 = vpop.f32.mrb[6].mxu1 }
 0x21e   :  { %405 = vst [vmem:[#allocation8 + $0x38] sm:$0xff] %v544_v15  ;;  %v393_v16 = vpop.f32.mrb[7].mxu1 }
 0x21f   :  { %404 = vst [vmem:[#allocation8 + $0x30] sm:$0xff] %v393_v16 }
 0x220   :  { %676 = shalt.err (!%p673_p0)
}
 0x221   :  { %s677_s6 = scalar_lea.hbm %s806_s4, 1024 }
 0x222   :  { %p678_p1 = scmp.ne.s32.totalorder %s806_s4, %s677_s6  ;;  %p681_p2 = scmp.lt.u32.totalorder %s677_s6, %s806_s4 }
 0x224   :  { %p683_p3 = pnand %p681_p2, %p678_p1 }
 0x226   :  { %686 = shalt.err (!%p683_p3)
}
 0x227   :  { %417 = dma.vmem_to_hbm [thread:$0]  %s412_s26, 1024, %s806_s4, [#allocation4], %s695_s27, %s695_s27, %s696_s28  }
 0x228   :  { %691 = dma.done.wait [#allocation4], 1024  }
 0x229   :  { %692 = vsyncadd [#allocation4], 4294966272 }
 0x22a   :  { %421 = vsyncpa [#allocation3], 1 }
 0x22b   :  { %422 = vsyncpa [#allocation6], 1 }
 0x22c   :  { %423 = vsyncpa [#allocation4], 1 }

</bundles_post_ra>
